<compile_context>
chip_gen: v7x
topology: tpu7x:2x2x1
jax: 0.10.0
libtpu: 0.0.40
codegen_flags: <defaults>
</compile_context>

<pallas_src>
import jax
import jax.numpy as jnp
from jax.experimental import pallas as pl
from jax.experimental.pallas import tpu as pltpu


def _make_kernel(hw, tk, bn, needs_mask):
    inv_hw = 1.0 / float(hw)

    def kernel(x_ref, w1_ref, w2_ref, o_ref, sum_acc, max_acc):
        # x_ref  : (bn, C, tk)   spatial chunk (channels on sublanes, HW on lanes)
        # w1_ref : (C, Cr) f32   fc1 weight, pre-transposed for pooled @ W1
        # w2_ref : (Cr, C) f32   fc2 weight, pre-transposed
        # o_ref  : (bn, 1, C)    sigmoid channel gates
        # sum_acc / max_acc : (bn, C, 1) f32 scratch (channel-on-sublane, so the
        #                     per-chunk lane-reduce needs no relayout)
        k = pl.program_id(1)

        @pl.when(k == 0)
        def _():
            sum_acc[...] = jnp.zeros_like(sum_acc)
            max_acc[...] = jnp.full_like(max_acc, -jnp.inf)

        xb = x_ref[...].astype(jnp.float32)                        # (bn, C, tk)
        if needs_mask:
            # Only emitted when no 128-aligned divisor of HW fits the budget.
            lane = jax.lax.broadcasted_iota(jnp.int32, xb.shape, 2)
            valid = (k * tk + lane) < hw
            x_sum = jnp.where(valid, xb, 0.0)
            x_max = jnp.where(valid, xb, -jnp.inf)
        else:
            x_sum = xb
            x_max = xb

        sum_acc[...] += jnp.sum(x_sum, axis=-1, keepdims=True)     # (bn, C, 1)
        max_acc[...] = jnp.maximum(max_acc[...],
                                   jnp.max(x_max, axis=-1, keepdims=True))

        @pl.when(k == pl.num_programs(1) - 1)
        def _():
            # One-time sublane->lane relayout of the pooled vectors.
            avg = jnp.sum(sum_acc[...], axis=-1) * inv_hw          # (bn, C)
            mx = jnp.max(max_acc[...], axis=-1)                    # (bn, C)
            w1 = w1_ref[...]                                       # (C, Cr) f32
            w2 = w2_ref[...]                                       # (Cr, C) f32
            h_avg = jnp.maximum(
                jnp.dot(avg, w1, preferred_element_type=jnp.float32), 0.0)
            h_max = jnp.maximum(
                jnp.dot(mx, w1, preferred_element_type=jnp.float32), 0.0)
            # fc2 is linear: fc2(h_avg) + fc2(h_max) == (h_avg + h_max) @ W2.
            logits = jnp.dot(h_avg + h_max, w2,
                             preferred_element_type=jnp.float32)   # (bn, C)
            o_ref[...] = jax.nn.sigmoid(logits).reshape(
                o_ref.shape).astype(o_ref.dtype)

    return kernel


def _choose_tk(hw, c, itemsize, budget_bytes):
    """Spatial chunk length: byte-budgeted, 128-aligned, tail-free if possible."""
    max_elems = max(128, budget_bytes // max(1, c * itemsize))
    if hw <= max_elems:
        # Whole plane per step: one fully-contiguous DMA, no tail.
        return hw, False
    limit = (max_elems // 128) * 128
    # Largest 128-multiple divisor of HW within the budget -> no tail mask.
    t = limit
    while t >= 128:
        if hw % t == 0:
            return t, False
        t -= 128
    # No aligned divisor fits: masked ragged tail.
    return limit, True


def _choose_bn(n, c, tk, itemsize, budget_bytes):
    """Batch rows per grid step (a divisor of N) within the block byte budget."""
    row_bytes = max(1, c * tk * itemsize)
    max_bn = int(min(n, max(1, budget_bytes // row_bytes), 128))
    bn = 1
    for d in range(1, max_bn + 1):
        if n % d == 0:
            bn = d
    return bn


def channel_attention_forward(x_nchw, fc1_weight, fc2_weight, *,
                              block_budget_bytes=4 * 1024 * 1024):
    """ChannelAttention forward.

    x_nchw     : (N, C, H, W)
    fc1_weight : (C//r, C, 1, 1)   PyTorch Conv2d(C, C//r, 1, bias=False) weight
    fc2_weight : (C, C//r, 1, 1)   PyTorch Conv2d(C//r, C, 1, bias=False) weight
    returns    : (N, C, 1, 1) sigmoid channel gates
    """
    N, C, H, W = x_nchw.shape
    Cr = fc1_weight.shape[0]
    dtype = x_nchw.dtype
    itemsize = jnp.dtype(dtype).itemsize
    HW = H * W

    # Free reshape (contiguous): channels -> sublanes, spatial -> lanes.
    x = x_nchw.reshape(N, C, HW)

    # 1x1 convs as channel matmuls; keep the tiny weights in f32 (no bf16
    # round-trip precision loss vs the PyTorch reference).
    w1t = jnp.transpose(fc1_weight.reshape(Cr, C), (1, 0)).astype(jnp.float32)  # (C, Cr)
    w2t = jnp.transpose(fc2_weight.reshape(C, Cr), (1, 0)).astype(jnp.float32)  # (Cr, C)

    tk, needs_mask = _choose_tk(HW, C, itemsize, block_budget_bytes)
    bn = _choose_bn(N, C, tk, itemsize, block_budget_bytes)
    num_chunks = pl.cdiv(HW, tk)

    # Explicit VMEM budget: double-buffered x blocks + padded weight tiles +
    # scratch + outputs, with margin.  Capped so it stays safe on v7x (64 MiB
    # physical per TC) and is >= the v5e 16 MiB scoped default.
    block_bytes = bn * C * tk * itemsize
    w_pad_bytes = 4 * (((C + 7) // 8 * 8) * 128 + 8 * ((C + 127) // 128 * 128))
    scratch_bytes = 2 * bn * ((C + 7) // 8 * 8) * 128 * 4
    out_pad_bytes = 2 * bn * ((C + 127) // 128 * 128) * itemsize
    vmem_need = 2 * block_bytes + 2 * w_pad_bytes + scratch_bytes + out_pad_bytes \
        + (2 << 20)
    vmem_limit = int(min(48 * 1024 * 1024, max(vmem_need, 16 * 1024 * 1024)))

    cost = pl.CostEstimate(
        flops=int(2 * N * C * HW + 6 * N * C * Cr),
        transcendentals=int(N * C),
        bytes_accessed=int(N * C * HW * itemsize + 2 * C * Cr * 4
                           + N * C * itemsize),
    )

    # TODO(synk): on v7x (2 TensorCores) the batch grid axis needs N//bn >= 2 to
    # feed both cores; N == 1 would require core-splitting the spatial axis with
    # per-core partial accumulators.
    out = pl.pallas_call(
        _make_kernel(HW, tk, bn, needs_mask),
        out_shape=jax.ShapeDtypeStruct((N, 1, C), dtype),
        grid_spec=pltpu.PrefetchScalarGridSpec(
            num_scalar_prefetch=0,
            grid=(N // bn, num_chunks),
            in_specs=[
                pl.BlockSpec((bn, C, tk), lambda n, k: (n, 0, k)),
                pl.BlockSpec((C, Cr), lambda n, k: (0, 0)),
                pl.BlockSpec((Cr, C), lambda n, k: (0, 0)),
            ],
            out_specs=pl.BlockSpec((bn, 1, C), lambda n, k: (n, 0, 0)),
            scratch_shapes=[
                pltpu.VMEM((bn, C, 1), jnp.float32),   # running sum
                pltpu.VMEM((bn, C, 1), jnp.float32),   # running max
            ],
        ),
        compiler_params=pltpu.CompilerParams(
            dimension_semantics=("parallel", "arbitrary"),
            vmem_limit_bytes=vmem_limit),
        cost_estimate=cost,
    )(x, w1t, w2t)

    return out.reshape(N, C, 1, 1)


def _reference(x, fc1_weight, fc2_weight):
    """Pure-jnp reference for ChannelAttention.forward."""
    N, C, H, W = x.shape
    Cr = fc1_weight.shape[0]
    xf = x.astype(jnp.float32)
    avg = jnp.mean(xf, axis=(2, 3))                                  # (N, C)
    mx = jnp.max(xf, axis=(2, 3))                                    # (N, C)
    W1 = fc1_weight.reshape(Cr, C).astype(jnp.float32)               # (Cr, C)
    W2 = fc2_weight.reshape(C, Cr).astype(jnp.float32)               # (C, Cr)

    def mlp(v):
        h = jnp.maximum(v @ W1.T, 0.0)                               # (N, Cr)
        return h @ W2.T                                              # (N, C)

    out = jax.nn.sigmoid(mlp(avg) + mlp(mx))
    return out[:, :, None, None]


if __name__ == "__main__":
    key = jax.random.PRNGKey(0)
    k_x, k_w1, k_w2 = jax.random.split(key, 3)

    # in_channels must be >= ratio so that C//ratio >= 1 (matches the module).
    N, C, H, W = 2, 64, 16, 16
    ratio = 16
    Cr = C // ratio                                                  # 4

    x = jax.random.normal(k_x, (N, C, H, W), dtype=jnp.float32)
    bound1 = 1.0 / (C ** 0.5)
    bound2 = 1.0 / (Cr ** 0.5)
    fc1_weight = jax.random.uniform(k_w1, (Cr, C, 1, 1), jnp.float32, -bound1, bound1)
    fc2_weight = jax.random.uniform(k_w2, (C, Cr, 1, 1), jnp.float32, -bound2, bound2)

    out = channel_attention_forward(x, fc1_weight, fc2_weight)
    out = jax.block_until_ready(out)

    ref = _reference(x, fc1_weight, fc2_weight)
    assert out.shape == (N, C, 1, 1), out.shape
    assert jnp.allclose(out, ref, atol=1e-5, rtol=1e-5), "mismatch vs reference"

    print("KERNEL_OK")
</pallas_src>

<mosaic_0001>
module attributes {stable_mosaic.version = 11 : i64} {
  func.func @kernel(%arg0: i32, %arg1: i32, %arg2: memref<2x64x256xf32, #tpu.memory_space<vmem>>, %arg3: memref<64x4xf32, #tpu.memory_space<vmem>>, %arg4: memref<4x64xf32, #tpu.memory_space<vmem>>, %arg5: memref<2x1x64xf32, #tpu.memory_space<vmem>>, %arg6: memref<2x64x1xf32, #tpu.memory_space<vmem>>, %arg7: memref<2x64x1xf32, #tpu.memory_space<vmem>>) attributes {dimension_semantics = [#tpu.dimension_semantics<parallel>, #tpu.dimension_semantics<arbitrary>], iteration_bounds = array<i64: 1, 1>, scalar_prefetch = 0 : i64, scratch_operands = 2 : i64, tpu.core_type = #tpu.core_type<tc>, window_params = [{transform_indices = @transform_0, window_bounds = array<i64: 2, 64, 256>}, {pipeline_mode = #tpu.pipeline_mode<synchronous>, transform_indices = @transform_1, window_bounds = array<i64: 64, 4>}, {pipeline_mode = #tpu.pipeline_mode<synchronous>, transform_indices = @transform_2, window_bounds = array<i64: 4, 64>}, {transform_indices = @transform_3, window_bounds = array<i64: 2, 1, 64>}]} {
    %c0_i32 = arith.constant 0 : i32
    %0 = arith.cmpi eq, %arg1, %c0_i32 : i32
    %1 = arith.extui %0 : i1 to i32
    %c0_i32_0 = arith.constant 0 : i32
    %2 = arith.cmpi ne, %1, %c0_i32_0 : i32
    scf.if %2 {
      %cst_18 = arith.constant 0.000000e+00 : f32
      %17 = vector.broadcast %cst_18 : f32 to vector<2x64x1xf32>
      %c0_19 = arith.constant 0 : index
      %c0_20 = arith.constant 0 : index
      %c0_21 = arith.constant 0 : index
      %18 = vector.load %arg6[%c0_19, %c0_20, %c0_21] : memref<2x64x1xf32, #tpu.memory_space<vmem>>, vector<2x64x1xf32>
      tpu.vector_store %arg6[%c0_19, %c0_20, %c0_21], %17 {strides = array<i32>} : memref<2x64x1xf32, #tpu.memory_space<vmem>>, vector<2x64x1xf32>,
      %cst_22 = arith.constant 0xFF800000 : f32
      %19 = vector.broadcast %cst_22 : f32 to vector<2x64x1xf32>
      %c0_23 = arith.constant 0 : index
      %c0_24 = arith.constant 0 : index
      %c0_25 = arith.constant 0 : index
      %20 = vector.load %arg7[%c0_23, %c0_24, %c0_25] : memref<2x64x1xf32, #tpu.memory_space<vmem>>, vector<2x64x1xf32>
      tpu.vector_store %arg7[%c0_23, %c0_24, %c0_25], %19 {strides = array<i32>} : memref<2x64x1xf32, #tpu.memory_space<vmem>>, vector<2x64x1xf32>,
    } else {
    }
    %c0 = arith.constant 0 : index
    %c0_1 = arith.constant 0 : index
    %c0_2 = arith.constant 0 : index
    %3 = vector.load %arg2[%c0, %c0_1, %c0_2] : memref<2x64x256xf32, #tpu.memory_space<vmem>>, vector<2x64x256xf32>
    %c0_3 = arith.constant 0 : index
    %c0_4 = arith.constant 0 : index
    %c0_5 = arith.constant 0 : index
    %4 = vector.load %arg6[%c0_3, %c0_4, %c0_5] : memref<2x64x1xf32, #tpu.memory_space<vmem>>, vector<2x64x1xf32>
    %cst = arith.constant dense<0.000000e+00> : vector<2x64xf32>
    %5 = vector.multi_reduction <add>, %3, %cst [2] : vector<2x64x256xf32> to vector<2x64xf32>
    %6 = vector.shape_cast %5 : vector<2x64xf32> to vector<2x64x1xf32>
    %7 = arith.addf %4, %6 : vector<2x64x1xf32>
    %c0_6 = arith.constant 0 : index
    %c0_7 = arith.constant 0 : index
    %c0_8 = arith.constant 0 : index
    %8 = vector.load %arg6[%c0_6, %c0_7, %c0_8] : memref<2x64x1xf32, #tpu.memory_space<vmem>>, vector<2x64x1xf32>
    tpu.vector_store %arg6[%c0_6, %c0_7, %c0_8], %7 {strides = array<i32>} : memref<2x64x1xf32, #tpu.memory_space<vmem>>, vector<2x64x1xf32>,
    %c0_9 = arith.constant 0 : index
    %c0_10 = arith.constant 0 : index
    %c0_11 = arith.constant 0 : index
    %9 = vector.load %arg7[%c0_9, %c0_10, %c0_11] : memref<2x64x1xf32, #tpu.memory_space<vmem>>, vector<2x64x1xf32>
    %cst_12 = arith.constant dense<0xFF800000> : vector<2x64xf32>
    %10 = vector.multi_reduction <maximumf>, %3, %cst_12 [2] : vector<2x64x256xf32> to vector<2x64xf32>
    %11 = vector.shape_cast %10 : vector<2x64xf32> to vector<2x64x1xf32>
    %12 = arith.maximumf %9, %11 : vector<2x64x1xf32>
    %c0_13 = arith.constant 0 : index
    %c0_14 = arith.constant 0 : index
    %c0_15 = arith.constant 0 : index
    %13 = vector.load %arg7[%c0_13, %c0_14, %c0_15] : memref<2x64x1xf32, #tpu.memory_space<vmem>>, vector<2x64x1xf32>
    tpu.vector_store %arg7[%c0_13, %c0_14, %c0_15], %12 {strides = array<i32>} : memref<2x64x1xf32, #tpu.memory_space<vmem>>, vector<2x64x1xf32>,
    %c0_i32_16 = arith.constant 0 : i32
    %14 = arith.cmpi eq, %arg1, %c0_i32_16 : i32
    %15 = arith.extui %14 : i1 to i32
    %c0_i32_17 = arith.constant 0 : i32
    %16 = arith.cmpi ne, %15, %c0_i32_17 : i32
    scf.if %16 {
      %c0_18 = arith.constant 0 : index
      %c0_19 = arith.constant 0 : index
      %c0_20 = arith.constant 0 : index
      %17 = vector.load %arg6[%c0_18, %c0_19, %c0_20] : memref<2x64x1xf32, #tpu.memory_space<vmem>>, vector<2x64x1xf32>
      %cst_21 = arith.constant dense<0.000000e+00> : vector<2x64xf32>
      %18 = vector.multi_reduction <add>, %17, %cst_21 [2] : vector<2x64x1xf32> to vector<2x64xf32>
      %cst_22 = arith.constant 3.906250e-03 : f32
      %19 = vector.broadcast %cst_22 : f32 to vector<2x64xf32>
      %20 = arith.mulf %18, %19 : vector<2x64xf32>
      %c0_23 = arith.constant 0 : index
      %c0_24 = arith.constant 0 : index
      %c0_25 = arith.constant 0 : index
      %21 = vector.load %arg7[%c0_23, %c0_24, %c0_25] : memref<2x64x1xf32, #tpu.memory_space<vmem>>, vector<2x64x1xf32>
      %cst_26 = arith.constant dense<0xFF800000> : vector<2x64xf32>
      %22 = vector.multi_reduction <maximumf>, %21, %cst_26 [2] : vector<2x64x1xf32> to vector<2x64xf32>
      %c0_27 = arith.constant 0 : index
      %c0_28 = arith.constant 0 : index
      %23 = vector.load %arg3[%c0_27, %c0_28] : memref<64x4xf32, #tpu.memory_space<vmem>>, vector<64x4xf32>
      %c0_29 = arith.constant 0 : index
      %c0_30 = arith.constant 0 : index
      %24 = vector.load %arg4[%c0_29, %c0_30] : memref<4x64xf32, #tpu.memory_space<vmem>>, vector<4x64xf32>
      %cst_31 = arith.constant dense<0.000000e+00> : vector<2x4xf32>
      %25 = tpu.matmul %20, %23, %cst_31 {dimension_numbers = #tpu.dot_dimension_numbers<[1], [0], [0], [1], [0, 0, 1, 1], [], []>} : vector<2x64xf32>, vector<64x4xf32>, vector<2x4xf32> -> vector<2x4xf32>
      %cst_32 = arith.constant 0.000000e+00 : f32
      %26 = vector.broadcast %cst_32 : f32 to vector<2x4xf32>
      %27 = arith.maximumf %25, %26 : vector<2x4xf32>
      %cst_33 = arith.constant dense<0.000000e+00> : vector<2x4xf32>
      %28 = tpu.matmul %22, %23, %cst_33 {dimension_numbers = #tpu.dot_dimension_numbers<[1], [0], [0], [1], [0, 0, 1, 1], [], []>} : vector<2x64xf32>, vector<64x4xf32>, vector<2x4xf32> -> vector<2x4xf32>
      %cst_34 = arith.constant 0.000000e+00 : f32
      %29 = vector.broadcast %cst_34 : f32 to vector<2x4xf32>
      %30 = arith.maximumf %28, %29 : vector<2x4xf32>
      %31 = arith.addf %27, %30 : vector<2x4xf32>
      %cst_35 = arith.constant dense<0.000000e+00> : vector<2x64xf32>
      %32 = tpu.matmul %31, %24, %cst_35 {dimension_numbers = #tpu.dot_dimension_numbers<[1], [0], [0], [1], [0, 0, 1, 1], [], []>} : vector<2x4xf32>, vector<4x64xf32>, vector<2x64xf32> -> vector<2x64xf32>
      %33 = arith.negf %32 : vector<2x64xf32>
      %34 = math.exp %33 : vector<2x64xf32>
      %cst_36 = arith.constant 1.000000e+00 : f32
      %35 = vector.broadcast %cst_36 : f32 to vector<2x64xf32>
      %36 = arith.addf %35, %34 : vector<2x64xf32>
      %37 = arith.divf %35, %36 : vector<2x64xf32>
      %38 = vector.shape_cast %37 : vector<2x64xf32> to vector<2x1x64xf32>
      %c0_37 = arith.constant 0 : index
      %c0_38 = arith.constant 0 : index
      %c0_39 = arith.constant 0 : index
      %39 = vector.load %arg5[%c0_37, %c0_38, %c0_39] : memref<2x1x64xf32, #tpu.memory_space<vmem>>, vector<2x1x64xf32>
      tpu.vector_store %arg5[%c0_37, %c0_38, %c0_39], %38 {strides = array<i32>} : memref<2x1x64xf32, #tpu.memory_space<vmem>>, vector<2x1x64xf32>,
    } else {
    }
    return
  }
  func.func @transform_0(%arg0: i32, %arg1: i32) -> (i32, i32, i32) {
    %c0_i32 = arith.constant 0 : i32
    %c0_i32_0 = arith.constant 0 : i32
    return %arg0, %c0_i32, %arg1 : i32, i32, i32
  }
  func.func @transform_1(%arg0: i32, %arg1: i32) -> (i32, i32) {
    %c0_i32 = arith.constant 0 : i32
    %c0_i32_0 = arith.constant 0 : i32
    %c0_i32_1 = arith.constant 0 : i32
    return %c0_i32, %c0_i32_0 : i32, i32
  }
  func.func @transform_2(%arg0: i32, %arg1: i32) -> (i32, i32) {
    %c0_i32 = arith.constant 0 : i32
    %c0_i32_0 = arith.constant 0 : i32
    %c0_i32_1 = arith.constant 0 : i32
    return %c0_i32, %c0_i32_0 : i32, i32
  }
  func.func @transform_3(%arg0: i32, %arg1: i32) -> (i32, i32, i32) {
    %c0_i32 = arith.constant 0 : i32
    %c0_i32_0 = arith.constant 0 : i32
    %c0_i32_1 = arith.constant 0 : i32
    return %arg0, %c0_i32, %c0_i32_0 : i32, i32, i32
  }
}

</mosaic_0001>

<bundles_post_ra>
// kernel: tpu_custom_call.1
= control target key start
LH: loop header
LB: loop body
LE: loop exit
PB: predicated region body
PF: predicated region fallthrough
CT: control target
= control target key end

     0   :  { %8 = vsyncpa [#allocation5], 0  ;;  %s1409_s0 = inlined_call_operand.hbm [shape: f32[2,64,256], index: 0, kind: input, shape index: {}]   ;;  %s1410_s1 = inlined_call_operand.vmem [shape: f32[64,4], index: 1, kind: input, shape index: {}]   ;;  %s1411_s2 = inlined_call_operand.vmem [shape: f32[4,64], index: 2, kind: input, shape index: {}]   ;;  %s1412_s3 = inlined_call_operand.hbm [shape: f32[2,1,64], index: 3, kind: output, shape index: {}]  }
   0x1   :  { %9 = vsyncpa [#allocation6], 0  ;;  %s1104_s12 = smov [#allocation4]   ;;  %s1056_s16 = scalar_lea.hbm %s1409_s0, 4096 }
   0x2   :  { %s15_s13 = sshll.u32 %s1104_s12, 4  ;;  %p1057_p0 = scmp.ne.s32.totalorder %s1409_s0, %s1056_s16  ;;  %s16_s13 = int_to_ptr.vmem [resolvable:$true] %s15_s13 }
   0x3   :  { %p1060_p1 = scmp.lt.u32.totalorder %s1056_s16, %s1409_s0 }
   0x5   :  { %p1062_p2 = pnand %p1060_p1, %p1057_p0 }
   0x7   :  { %1065 = shalt.err (!%p1062_p2)
}
   0x8   :  { %s1066_s21 = scalar_lea.vmem %s16_s13, 4096  ;;  %p1071_p4 = scmp.lt.s32.totalorder %s16_s13, %s16_s13 }
   0x9   :  { %p1067_p3 = scmp.ne.s32.totalorder %s16_s13, %s1066_s21  ;;  %p1072_p5 = scmp.lt.s32.totalorder %s1066_s21, %s1066_s21 }
   0xb   :  { %p1073_p6 = por %p1072_p5, %p1071_p4 }
   0xd   :  { %p1074_p7 = pnand %p1073_p6, %p1067_p3 }
   0xf   :  { %1077 = shalt.err (!%p1074_p7)
}
  0x10   :  { %s1105_s22 = smov 256   ;;  %s1106_s23 = smov 16  }
  0x11   :  { %21 = dma.hbm_to_vmem [thread:$0]  %s1409_s0, 4096, %s16_s13, [#allocation5], %s1105_s22, %s1105_s22, %s1106_s23  }
  0x12   :  { %1100 = dma.done.wait [#allocation5], 4096  }
  0x13   :  { %1101 = vsyncadd [#allocation5], 4294963200  ;;  %vm33_vm0 = vcmask 7168   ;;  %v1107_v0 = vmov 0.0   ;;  %v82_v1 = vld [vmem:[#allocation4 + $0x80] sm:$0xff]  ;;  %v83_v2 = vld [vmem:[#allocation4 + $0x88] sm:$0xff] }
  0x14   :  { %42 = vst.msk [vmem:[#allocation2 + $0x40] sm:$0xff] %vm33_vm0, %v1107_v0  ;;  %34 = vst.msk [vmem:[#allocation2] sm:$0xff] %vm33_vm0, %v1107_v0  ;;  %v66_v3 = vld [vmem:[#allocation4] sm:$0xff]  ;;  %v138_v4 = vadd.f32 %v83_v2, %v82_v1  ;;  %v67_v5 = vld [vmem:[#allocation4 + $0x8] sm:$0xff]  ;;  %v235_v28 = vmax.f32 %v82_v1, %v83_v2  ;;  %v1108_v35 = vmov -inf   ;;  %v1109_v53 = vmov 0  }
  0x15   :  { %35 = vst.msk [vmem:[#allocation2 + $0x8] sm:$0xff] %vm33_vm0, %v1107_v0  ;;  %36 = vst.msk [vmem:[#allocation2 + $0x10] sm:$0xff] %vm33_vm0, %v1107_v0  ;;  %v84_v6 = vld [vmem:[#allocation4 + $0x90] sm:$0xff]  ;;  %v85_v7 = vld [vmem:[#allocation4 + $0x98] sm:$0xff]  ;;  %v114_v8 = vadd.f32 %v67_v5, %v66_v3  ;;  %v211_v26 = vmax.f32 %v66_v3, %v67_v5  ;;  %1051 = vset.pattern.permute.xlu0 %v1109_v53  ;;  %1050 = vset.pattern.permute.xlu1 %v1109_v53  ;;  %vm1111_vm1 = vmmov 0   ;;  %vm442_vm2 = vcmask 130112  }
  0x16   :  { %37 = vst.msk [vmem:[#allocation2 + $0x18] sm:$0xff] %vm33_vm0, %v1107_v0  ;;  %38 = vst.msk [vmem:[#allocation2 + $0x20] sm:$0xff] %vm33_vm0, %v1107_v0  ;;  %v68_v9 = vld [vmem:[#allocation4 + $0x10] sm:$0xff]  ;;  %v69_v10 = vld [vmem:[#allocation4 + $0x18] sm:$0xff]  ;;  %139 = vadd.xlane.f32.xlu1 %v138_v4  ;;  %v141_v11 = vadd.f32 %v85_v7, %v84_v6  ;;  %v238_v27 = vmax.f32 %v84_v6, %v85_v7  ;;  %988 = vmatprep.mubr.msk.f32.mxu0 %vm1111_vm1, %v1107_v0  ;;  %vm449_vm3 = vcmask 195712   ;;  %vm456_vm4 = vcmask 261312  }
  0x17   :  { %39 = vst.msk [vmem:[#allocation2 + $0x28] sm:$0xff] %vm33_vm0, %v1107_v0  ;;  %40 = vst.msk [vmem:[#allocation2 + $0x30] sm:$0xff] %vm33_vm0, %v1107_v0  ;;  %115 = vadd.xlane.f32.xlu0 %v114_v8  ;;  %v117_v12 = vadd.f32 %v69_v10, %v68_v9  ;;  %v86_v13 = vld [vmem:[#allocation4 + $0xa0] sm:$0xff]  ;;  %v87_v14 = vld [vmem:[#allocation4 + $0xa8] sm:$0xff]  ;;  %v214_v25 = vmax.f32 %v68_v9, %v69_v10  ;;  %1007 = vmatprep.mubr.msk.f32.mxu1 %vm1111_vm1, %v1107_v0  ;;  %vm463_vm5 = vcmask 326912   ;;  %vm470_vm6 = vcmask 392512  }
  0x18   :  { %41 = vst.msk [vmem:[#allocation2 + $0x38] sm:$0xff] %vm33_vm0, %v1107_v0  ;;  %43 = vst.msk [vmem:[#allocation2 + $0x48] sm:$0xff] %vm33_vm0, %v1107_v0  ;;  %v70_v15 = vld [vmem:[#allocation4 + $0x20] sm:$0xff]  ;;  %v71_v16 = vld [vmem:[#allocation4 + $0x28] sm:$0xff]  ;;  %v144_v17 = vadd.f32 %v87_v14, %v86_v13  ;;  %v241_v36 = vmax.f32 %v86_v13, %v87_v14  ;;  %vm484_vm7 = vcmask 523712   ;;  %vm477_vm8 = vcmask 458112  }
  0x19   :  { %44 = vst.msk [vmem:[#allocation2 + $0x50] sm:$0xff] %vm33_vm0, %v1107_v0  ;;  %45 = vst.msk [vmem:[#allocation2 + $0x58] sm:$0xff] %vm33_vm0, %v1107_v0  ;;  %v120_v18 = vadd.f32 %v71_v16, %v70_v15  ;;  %v88_v19 = vld [vmem:[#allocation4 + $0xb0] sm:$0xff]  ;;  %v89_v20 = vld [vmem:[#allocation4 + $0xb8] sm:$0xff]  ;;  %v217_v37 = vmax.f32 %v70_v15, %v71_v16  ;;  %vm525_vm9 = vcmask 1041409   ;;  %vm527_vm10 = vcmask 523264  }
  0x1a   :  { %46 = vst.msk [vmem:[#allocation2 + $0x60] sm:$0xff] %vm33_vm0, %v1107_v0  ;;  %47 = vst.msk [vmem:[#allocation2 + $0x68] sm:$0xff] %vm33_vm0, %v1107_v0  ;;  %142 = vadd.xlane.f32.xlu1 %v141_v11  ;;  %v72_v21 = vld [vmem:[#allocation4 + $0x30] sm:$0xff]  ;;  %v73_v22 = vld [vmem:[#allocation4 + $0x38] sm:$0xff]  ;;  %v147_v23 = vadd.f32 %v89_v20, %v88_v19  ;;  %v244_v44 = vmax.f32 %v88_v19, %v89_v20  ;;  %vm822_vm11 = vcmask 1043456   ;;  %vm818_vm12 = vcmask 31744  }
  0x1b   :  { %48 = vst.msk [vmem:[#allocation2 + $0x70] sm:$0xff] %vm33_vm0, %v1107_v0  ;;  %49 = vst.msk [vmem:[#allocation2 + $0x78] sm:$0xff] %vm33_vm0, %v1107_v0  ;;  %118 = vadd.xlane.f32.xlu0 %v117_v12  ;;  %v123_v24 = vadd.f32 %v73_v22, %v72_v21  ;;  %v90_v29 = vld [vmem:[#allocation4 + $0xc0] sm:$0xff]  ;;  %v91_v30 = vld [vmem:[#allocation4 + $0xc8] sm:$0xff]  ;;  %v220_v45 = vmax.f32 %v72_v21, %v73_v22  ;;  %vm927_vm13 = vcmask 516096  }
  0x1c   :  { %v74_v31 = vld [vmem:[#allocation4 + $0x40] sm:$0xff]  ;;  %v75_v32 = vld [vmem:[#allocation4 + $0x48] sm:$0xff]  ;;  %v150_v33 = vadd.f32 %v91_v30, %v90_v29  ;;  %51 = vst.msk [vmem:[#allocation3 + $0x8] sm:$0xff] %vm33_vm0, %v1108_v35  ;;  %50 = vst.msk [vmem:[#allocation3] sm:$0xff] %vm33_vm0, %v1108_v35  ;;  %v247_v52 = vmax.f32 %v90_v29, %v91_v30 }
  0x1d   :  { %v126_v34 = vadd.f32 %v75_v32, %v74_v31  ;;  %52 = vst.msk [vmem:[#allocation3 + $0x10] sm:$0xff] %vm33_vm0, %v1108_v35  ;;  %53 = vst.msk [vmem:[#allocation3 + $0x18] sm:$0xff] %vm33_vm0, %v1108_v35  ;;  %v92_v38 = vld [vmem:[#allocation4 + $0xd0] sm:$0xff]  ;;  %v93_v39 = vld [vmem:[#allocation4 + $0xd8] sm:$0xff]  ;;  %v223_v54 = vmax.f32 %v74_v31, %v75_v32 }
  0x1e   :  { %145 = vadd.xlane.f32.xlu1 %v144_v17  ;;  %54 = vst.msk [vmem:[#allocation3 + $0x20] sm:$0xff] %vm33_vm0, %v1108_v35  ;;  %55 = vst.msk [vmem:[#allocation3 + $0x28] sm:$0xff] %vm33_vm0, %v1108_v35  ;;  %v76_v40 = vld [vmem:[#allocation4 + $0x50] sm:$0xff]  ;;  %v77_v41 = vld [vmem:[#allocation4 + $0x58] sm:$0xff]  ;;  %v153_v42 = vadd.f32 %v93_v39, %v92_v38  ;;  %v250_v61 = vmax.f32 %v92_v38, %v93_v39 }
  0x1f   :  { %121 = vadd.xlane.f32.xlu0 %v120_v18  ;;  %56 = vst.msk [vmem:[#allocation3 + $0x30] sm:$0xff] %vm33_vm0, %v1108_v35  ;;  %57 = vst.msk [vmem:[#allocation3 + $0x38] sm:$0xff] %vm33_vm0, %v1108_v35  ;;  %v129_v43 = vadd.f32 %v77_v41, %v76_v40  ;;  %v94_v46 = vld [vmem:[#allocation4 + $0xe0] sm:$0xff]  ;;  %v95_v47 = vld [vmem:[#allocation4 + $0xe8] sm:$0xff]  ;;  %v226_v62 = vmax.f32 %v76_v40, %v77_v41 }
  0x20   :  { %58 = vst.msk [vmem:[#allocation3 + $0x40] sm:$0xff] %vm33_vm0, %v1108_v35  ;;  %59 = vst.msk [vmem:[#allocation3 + $0x48] sm:$0xff] %vm33_vm0, %v1108_v35  ;;  %v78_v48 = vld [vmem:[#allocation4 + $0x60] sm:$0xff]  ;;  %v79_v49 = vld [vmem:[#allocation4 + $0x68] sm:$0xff]  ;;  %v156_v50 = vadd.f32 %v95_v47, %v94_v46  ;;  %v253_v63 = vmax.f32 %v94_v46, %v95_v47 }
  0x21   :  { %60 = vst.msk [vmem:[#allocation3 + $0x50] sm:$0xff] %vm33_vm0, %v1108_v35  ;;  %61 = vst.msk [vmem:[#allocation3 + $0x58] sm:$0xff] %vm33_vm0, %v1108_v35  ;;  %v132_v51 = vadd.f32 %v79_v49, %v78_v48  ;;  %v96_v55 = vld [vmem:[#allocation4 + $0xf0] sm:$0xff]  ;;  %v97_v56 = vld [vmem:[#allocation4 + $0xf8] sm:$0xff]  ;;  %v229_v1 = vmax.f32 %v78_v48, %v79_v49 }
  0x22   :  { %148 = vadd.xlane.f32.xlu1 %v147_v23  ;;  %62 = vst.msk [vmem:[#allocation3 + $0x60] sm:$0xff] %vm33_vm0, %v1108_v35  ;;  %63 = vst.msk [vmem:[#allocation3 + $0x68] sm:$0xff] %vm33_vm0, %v1108_v35  ;;  %v80_v57 = vld [vmem:[#allocation4 + $0x70] sm:$0xff]  ;;  %v81_v58 = vld [vmem:[#allocation4 + $0x78] sm:$0xff]  ;;  %v159_v59 = vadd.f32 %v97_v56, %v96_v55  ;;  %v256_v2 = vmax.f32 %v96_v55, %v97_v56 }
  0x23   :  { %124 = vadd.xlane.f32.xlu0 %v123_v24  ;;  %64 = vst.msk [vmem:[#allocation3 + $0x70] sm:$0xff] %vm33_vm0, %v1108_v35  ;;  %65 = vst.msk [vmem:[#allocation3 + $0x78] sm:$0xff] %vm33_vm0, %v1108_v35  ;;  %v135_v60 = vadd.f32 %v81_v58, %v80_v57  ;;  %v232_v3 = vmax.f32 %v80_v57, %v81_v58  ;;  %v106_v4 = vld [vmem:[#allocation2 + $0x40] sm:$0xff]  ;;  %v107_v10 = vld [vmem:[#allocation2 + $0x48] sm:$0xff] }
  0x24   :  { %v98_v5 = vld [vmem:[#allocation2] sm:$0xff]  ;;  %v99_v11 = vld [vmem:[#allocation2 + $0x8] sm:$0xff]  ;;  %v108_v16 = vld [vmem:[#allocation2 + $0x50] sm:$0xff] }
  0x25   :  { %v100_v17 = vld [vmem:[#allocation2 + $0x10] sm:$0xff]  ;;  %v109_v22 = vld [vmem:[#allocation2 + $0x58] sm:$0xff]  ;;  %v195_v29 = vld [vmem:[#allocation3] sm:$0xff] }
  0x26   :  { %215 = vmax.xlane.f32.xlu1 %v214_v25  ;;  %v101_v23 = vld [vmem:[#allocation2 + $0x18] sm:$0xff]  ;;  %v110_v40 = vld [vmem:[#allocation2 + $0x60] sm:$0xff]  ;;  %v197_v48 = vld [vmem:[#allocation3 + $0x10] sm:$0xff] }
  0x27   :  { %212 = vmax.xlane.f32.xlu0 %v211_v26  ;;  %v203_v35 = vld [vmem:[#allocation3 + $0x40] sm:$0xff]  ;;  %v103_v55 = vld [vmem:[#allocation2 + $0x28] sm:$0xff] }
  0x28   :  { %v102_v41 = vld [vmem:[#allocation2 + $0x20] sm:$0xff]  ;;  %v205_v46 = vld [vmem:[#allocation3 + $0x50] sm:$0xff] }
  0x2a   :  { %239 = vmax.xlane.f32.xlu1 %v238_v27 }
  0x2b   :  { %236 = vmax.xlane.f32.xlu0 %v235_v28  ;;  %v196_v28 = vld [vmem:[#allocation3 + $0x8] sm:$0xff] }
  0x2e   :  { %151 = vadd.xlane.f32.xlu1 %v150_v33 }
  0x2f   :  { %127 = vadd.xlane.f32.xlu0 %v126_v34  ;;  %v204_v34 = vld [vmem:[#allocation3 + $0x48] sm:$0xff] }
  0x32   :  { %242 = vmax.xlane.f32.xlu1 %v241_v36 }
  0x33   :  { %218 = vmax.xlane.f32.xlu0 %v217_v37 }
  0x36   :  { %154 = vadd.xlane.f32.xlu1 %v153_v42 }
  0x37   :  { %130 = vadd.xlane.f32.xlu0 %v129_v43 }
  0x3a   :  { %245 = vmax.xlane.f32.xlu1 %v244_v44 }
  0x3b   :  { %221 = vmax.xlane.f32.xlu0 %v220_v45 }
  0x3e   :  { %157 = vadd.xlane.f32.xlu1 %v156_v50 }
  0x3f   :  { %133 = vadd.xlane.f32.xlu0 %v132_v51 }
  0x42   :  { %248 = vmax.xlane.f32.xlu1 %v247_v52 }
  0x43   :  { %224 = vmax.xlane.f32.xlu0 %v223_v54  ;;  %v111_v54 = vld [vmem:[#allocation2 + $0x68] sm:$0xff] }
  0x46   :  { %160 = vadd.xlane.f32.xlu1 %v159_v59 }
  0x47   :  { %136 = vadd.xlane.f32.xlu0 %v135_v60  ;;  %v206_v60 = vld [vmem:[#allocation3 + $0x58] sm:$0xff] }
  0x4a   :  { %251 = vmax.xlane.f32.xlu1 %v250_v61 }
  0x4b   :  { %227 = vmax.xlane.f32.xlu0 %v226_v62  ;;  %v198_v62 = vld [vmem:[#allocation3 + $0x18] sm:$0xff] }
  0x4e   :  { %254 = vmax.xlane.f32.xlu1 %v253_v63 }
  0x4f   :  { %230 = vmax.xlane.f32.xlu0 %v229_v1 }
  0x52   :  { %257 = vmax.xlane.f32.xlu1 %v256_v2 }
  0x53   :  { %233 = vmax.xlane.f32.xlu0 %v232_v3 }
  0xa3   :  { %v140_v6 = vpop.xlane.xlu1 %139 }
  0xa4   :  { %v170_v7 = vadd.f32 %v140_v6, %v106_v4  ;;  %v116_v8 = vpop.xlane.xlu0 %115 }
  0xa5   :  { %v162_v9 = vadd.f32 %v116_v8, %v98_v5  ;;  %v112_v5 = vld [vmem:[#allocation2 + $0x70] sm:$0xff] }
  0xa6   :  { %187 = vst.msk [vmem:[#allocation2 + $0x40] sm:$0xff] %vm33_vm0, %v170_v7  ;;  %v104_v7 = vld [vmem:[#allocation2 + $0x30] sm:$0xff] }
  0xa7   :  { %179 = vst.msk [vmem:[#allocation2] sm:$0xff] %vm33_vm0, %v162_v9  ;;  %v143_v12 = vpop.xlane.xlu1 %142 }
  0xa8   :  { %v171_v13 = vadd.f32 %v143_v12, %v107_v10  ;;  %v119_v14 = vpop.xlane.xlu0 %118  ;;  %v207_v12 = vld [vmem:[#allocation3 + $0x60] sm:$0xff] }
  0xa9   :  { %v163_v15 = vadd.f32 %v119_v14, %v99_v11  ;;  %v199_v14 = vld [vmem:[#allocation3 + $0x20] sm:$0xff] }
  0xaa   :  { %188 = vst.msk [vmem:[#allocation2 + $0x48] sm:$0xff] %vm33_vm0, %v171_v13 }
  0xab   :  { %180 = vst.msk [vmem:[#allocation2 + $0x8] sm:$0xff] %vm33_vm0, %v163_v15  ;;  %v146_v18 = vpop.xlane.xlu1 %145 }
  0xac   :  { %v172_v19 = vadd.f32 %v146_v18, %v108_v16  ;;  %v122_v20 = vpop.xlane.xlu0 %121 }
  0xad   :  { %v164_v21 = vadd.f32 %v122_v20, %v100_v17  ;;  %v113_v20 = vld [vmem:[#allocation2 + $0x78] sm:$0xff] }
  0xae   :  { %189 = vst.msk [vmem:[#allocation2 + $0x50] sm:$0xff] %vm33_vm0, %v172_v19 }
  0xaf   :  { %181 = vst.msk [vmem:[#allocation2 + $0x10] sm:$0xff] %vm33_vm0, %v164_v21  ;;  %v149_v24 = vpop.xlane.xlu1 %148 }
  0xb0   :  { %v173_v25 = vadd.f32 %v149_v24, %v109_v22  ;;  %v125_v26 = vpop.xlane.xlu0 %124  ;;  %v105_v22 = vld [vmem:[#allocation2 + $0x38] sm:$0xff] }
  0xb1   :  { %v165_v27 = vadd.f32 %v125_v26, %v101_v23 }
  0xb2   :  { %190 = vst.msk [vmem:[#allocation2 + $0x58] sm:$0xff] %vm33_vm0, %v173_v25 }
  0xb3   :  { %182 = vst.msk [vmem:[#allocation2 + $0x18] sm:$0xff] %vm33_vm0, %v165_v27  ;;  %v216_v30 = vpop.xlane.xlu1 %215  ;;  %v208_v27 = vld [vmem:[#allocation3 + $0x68] sm:$0xff] }
  0xb4   :  { %v260_v31 = vmax.f32 %v196_v28, %v216_v30  ;;  %v213_v32 = vpop.xlane.xlu0 %212  ;;  %v200_v28 = vld [vmem:[#allocation3 + $0x28] sm:$0xff] }
  0xb5   :  { %v259_v33 = vmax.f32 %v195_v29, %v213_v32 }
  0xb6   :  { %276 = vst.msk [vmem:[#allocation3 + $0x8] sm:$0xff] %vm33_vm0, %v260_v31 }
  0xb7   :  { %275 = vst.msk [vmem:[#allocation3] sm:$0xff] %vm33_vm0, %v259_v33  ;;  %v240_v36 = vpop.xlane.xlu1 %239 }
  0xb8   :  { %v268_v37 = vmax.f32 %v204_v34, %v240_v36  ;;  %v237_v38 = vpop.xlane.xlu0 %236  ;;  %v209_v34 = vld [vmem:[#allocation3 + $0x70] sm:$0xff] }
  0xb9   :  { %v267_v39 = vmax.f32 %v203_v35, %v237_v38  ;;  %v201_v36 = vld [vmem:[#allocation3 + $0x30] sm:$0xff] }
  0xba   :  { %284 = vst.msk [vmem:[#allocation3 + $0x48] sm:$0xff] %vm33_vm0, %v268_v37 }
  0xbb   :  { %283 = vst.msk [vmem:[#allocation3 + $0x40] sm:$0xff] %vm33_vm0, %v267_v39  ;;  %v152_v42 = vpop.xlane.xlu1 %151 }
  0xbc   :  { %v174_v43 = vadd.f32 %v152_v42, %v110_v40  ;;  %v128_v44 = vpop.xlane.xlu0 %127  ;;  %v202_v42 = vld [vmem:[#allocation3 + $0x38] sm:$0xff] }
  0xbd   :  { %v166_v45 = vadd.f32 %v128_v44, %v102_v41  ;;  %v343_v52 = vld [vmem:[#allocation3 + $0x8] sm:$0xff]  ;;  %v210_v41 = vld [vmem:[#allocation3 + $0x78] sm:$0xff] }
  0xbe   :  { %191 = vst.msk [vmem:[#allocation2 + $0x60] sm:$0xff] %vm33_vm0, %v174_v43  ;;  %v342_v47 = vld [vmem:[#allocation3] sm:$0xff] }
  0xbf   :  { %183 = vst.msk [vmem:[#allocation2 + $0x20] sm:$0xff] %vm33_vm0, %v166_v45  ;;  %618 = vperm.xlu1 %1050, %v342_v47   ;;  %v243_v49 = vpop.xlane.xlu1 %242 }
  0xc0   :  { %v269_v50 = vmax.f32 %v205_v46, %v243_v49  ;;  %v219_v51 = vpop.xlane.xlu0 %218 }
  0xc1   :  { %v261_v53 = vmax.f32 %v197_v48, %v219_v51  ;;  %v351_v3 = vld [vmem:[#allocation3 + $0x48] sm:$0xff] }
  0xc2   :  { %285 = vst.msk [vmem:[#allocation3 + $0x50] sm:$0xff] %vm33_vm0, %v269_v50  ;;  %v350_v61 = vld [vmem:[#allocation3 + $0x40] sm:$0xff] }
  0xc3   :  { %277 = vst.msk [vmem:[#allocation3 + $0x10] sm:$0xff] %vm33_vm0, %v261_v53  ;;  %621 = vperm.xlu1 %1050, %v343_v52   ;;  %v155_v56 = vpop.xlane.xlu1 %154  ;;  %v294_v50 = vld [vmem:[#allocation2] sm:$0xff]  ;;  %v295_v52 = vld [vmem:[#allocation2 + $0x8] sm:$0xff] }
  0xc4   :  { %v175_v57 = vadd.f32 %v155_v56, %v111_v54  ;;  %v131_v58 = vpop.xlane.xlu0 %130  ;;  %v326_v53 = vmul.f32 0.00390625, %v294_v50  ;;  %v327_v54 = vmul.f32 0.00390625, %v295_v52  ;;  %v302_v56 = vld [vmem:[#allocation2 + $0x40] sm:$0xff] }
  0xc5   :  { %v167_v59 = vadd.f32 %v131_v58, %v103_v55  ;;  %v304_v55 = vld [vmem:[#allocation2 + $0x50] sm:$0xff]  ;;  %v334_v58 = vmul.f32 0.00390625, %v302_v56 }
  0xc6   :  { %192 = vst.msk [vmem:[#allocation2 + $0x68] sm:$0xff] %vm33_vm0, %v175_v57  ;;  %v336_v57 = vmul.f32 0.00390625, %v304_v55 }
  0xc7   :  { %184 = vst.msk [vmem:[#allocation2 + $0x28] sm:$0xff] %vm33_vm0, %v167_v59  ;;  %642 = vperm.xlu1 %1050, %v350_v61   ;;  %v246_v63 = vpop.xlane.xlu1 %245  ;;  %v305_v59 = vld [vmem:[#allocation2 + $0x58] sm:$0xff] }
  0xc8   :  { %v270_v1 = vmax.f32 %v206_v60, %v246_v63  ;;  %v222_v2 = vpop.xlane.xlu0 %221  ;;  %v303_v60 = vld [vmem:[#allocation2 + $0x48] sm:$0xff]  ;;  %v337_v61 = vmul.f32 0.00390625, %v305_v59  ;;  %v306_v63 = vld [vmem:[#allocation2 + $0x60] sm:$0xff] }
  0xc9   :  { %v262_v4 = vmax.f32 %v198_v62, %v222_v2  ;;  %v352_v6 = vld [vmem:[#allocation3 + $0x50] sm:$0xff]  ;;  %v335_v62 = vmul.f32 0.00390625, %v303_v60  ;;  %v338_v2 = vmul.f32 0.00390625, %v306_v63 }
  0xca   :  { %286 = vst.msk [vmem:[#allocation3 + $0x58] sm:$0xff] %vm33_vm0, %v270_v1  ;;  %648 = vperm.xlu0 %1051, %v352_v6   ;;  %v344_v13 = vld [vmem:[#allocation3 + $0x10] sm:$0xff] }
  0xcb   :  { %278 = vst.msk [vmem:[#allocation3 + $0x18] sm:$0xff] %vm33_vm0, %v262_v4  ;;  %645 = vperm.xlu1 %1050, %v351_v3   ;;  %v158_v8 = vpop.xlane.xlu1 %157  ;;  %v296_v1 = vld [vmem:[#allocation2 + $0x10] sm:$0xff] }
  0xcc   :  { %v176_v9 = vadd.f32 %v158_v8, %v112_v5  ;;  %v134_v10 = vpop.xlane.xlu0 %133  ;;  %v328_v3 = vmul.f32 0.00390625, %v296_v1  ;;  %v297_v5 = vld [vmem:[#allocation2 + $0x18] sm:$0xff] }
  0xcd   :  { %v168_v11 = vadd.f32 %v134_v10, %v104_v7  ;;  %v307_v4 = vld [vmem:[#allocation2 + $0x68] sm:$0xff]  ;;  %v329_v7 = vmul.f32 0.00390625, %v297_v5 }
  0xce   :  { %193 = vst.msk [vmem:[#allocation2 + $0x70] sm:$0xff] %vm33_vm0, %v176_v9  ;;  %v339_v6 = vmul.f32 0.00390625, %v307_v4  ;;  %v298_v9 = vld [vmem:[#allocation2 + $0x20] sm:$0xff] }
  0xcf   :  { %185 = vst.msk [vmem:[#allocation2 + $0x30] sm:$0xff] %vm33_vm0, %v168_v11  ;;  %624 = vperm.xlu1 %1050, %v344_v13   ;;  %v249_v15 = vpop.xlane.xlu1 %248  ;;  %v330_v11 = vmul.f32 0.00390625, %v298_v9  ;;  %v358_v13 = vld [vmem:[%s1410_s1] sm:$0xff] }
  0xd0   :  { %v271_v16 = vmax.f32 %v207_v12, %v249_v15  ;;  %v225_v17 = vpop.xlane.xlu0 %224  ;;  %v299_v15 = vld [vmem:[#allocation2 + $0x28] sm:$0xff] }
  0xd1   :  { %v263_v18 = vmax.f32 %v199_v14, %v225_v17  ;;  %v353_v19 = vld [vmem:[#allocation3 + $0x58] sm:$0xff]  ;;  %v359_v14 = vld [vmem:[%s1410_s1 + $0x8] sm:$0xff]  ;;  %v1110_v17 = vmov 0.0|0.0  }
  0xd2   :  { %287 = vst.msk [vmem:[#allocation3 + $0x60] sm:$0xff] %vm33_vm0, %v271_v16  ;;  %651 = vperm.xlu0 %1051, %v353_v19   ;;  %v345_v21 = vld [vmem:[#allocation3 + $0x18] sm:$0xff]  ;;  %v1016_v16 = vpack.c.bf16 %v359_v14, %v358_v13  ;;  %1015 = vmatprep.subr.bf16.mxu0 %v1110_v17  ;;  %v331_v19 = vmul.f32 0.00390625, %v299_v15 }
  0xd3   :  { %279 = vst.msk [vmem:[#allocation3 + $0x20] sm:$0xff] %vm33_vm0, %v263_v18  ;;  %627 = vperm.xlu1 %1050, %v345_v21   ;;  %v161_v23 = vpop.xlane.xlu1 %160  ;;  %1027 = vmatprep.subr.bf16.mxu1 %v1110_v17  ;;  %v361_v21 = vld [vmem:[%s1410_s1 + $0x18] sm:$0xff] }
  0xd4   :  { %v177_v24 = vadd.f32 %v161_v23, %v113_v20  ;;  %v137_v25 = vpop.xlane.xlu0 %136  ;;  %1017 = vmatpush3.bf16.msra.mxu0 %v1016_v16  ;;  %v360_v20 = vld [vmem:[%s1410_s1 + $0x10] sm:$0xff]  ;;  %1029 = vmatpush3.bf16.msra.mxu1 %v1016_v16 }
  0xd5   :  { %v169_v26 = vadd.f32 %v137_v25, %v105_v22  ;;  %v308_v8 = vld [vmem:[#allocation2 + $0x70] sm:$0xff]  ;;  %1018 = vmatprep.subr.bf16.mxu0 %v1110_v17  ;;  %v1019_v23 = vpack.c.bf16 %v361_v21, %v360_v20  ;;  %1030 = vmatprep.subr.bf16.mxu1 %v1110_v17 }
  0xd6   :  { %194 = vst.msk [vmem:[#allocation2 + $0x78] sm:$0xff] %vm33_vm0, %v177_v24  ;;  %v340_v10 = vmul.f32 0.00390625, %v308_v8  ;;  %v300_v22 = vld [vmem:[#allocation2 + $0x30] sm:$0xff] }
  0xd7   :  { %186 = vst.msk [vmem:[#allocation2 + $0x38] sm:$0xff] %vm33_vm0, %v169_v26  ;;  %v252_v29 = vpop.xlane.xlu1 %251  ;;  %v332_v25 = vmul.f32 0.00390625, %v300_v22  ;;  %v362_v26 = vld [vmem:[%s1410_s1 + $0x20] sm:$0xff] }
  0xd8   :  { %v272_v30 = vmax.f32 %v208_v27, %v252_v29  ;;  %v228_v31 = vpop.xlane.xlu0 %227  ;;  %1020 = vmatpush3.bf16.msra.mxu0 %v1019_v23  ;;  %v363_v27 = vld [vmem:[%s1410_s1 + $0x28] sm:$0xff]  ;;  %1032 = vmatpush3.bf16.msra.mxu1 %v1019_v23 }
  0xd9   :  { %v264_v32 = vmax.f32 %v200_v28, %v228_v31  ;;  %v354_v33 = vld [vmem:[#allocation3 + $0x60] sm:$0xff]  ;;  %1021 = vmatprep.subr.bf16.mxu0 %v1110_v17  ;;  %v1022_v29 = vpack.c.bf16 %v363_v27, %v362_v26  ;;  %1033 = vmatprep.subr.bf16.mxu1 %v1110_v17  ;;  %v364_v31 = vld [vmem:[%s1410_s1 + $0x30] sm:$0xff] }
  0xda   :  { %288 = vst.msk [vmem:[#allocation3 + $0x68] sm:$0xff] %vm33_vm0, %v272_v30  ;;  %654 = vperm.xlu0 %1051, %v354_v33   ;;  %v346_v35 = vld [vmem:[#allocation3 + $0x20] sm:$0xff] }
  0xdb   :  { %280 = vst.msk [vmem:[#allocation3 + $0x28] sm:$0xff] %vm33_vm0, %v264_v32  ;;  %630 = vperm.xlu1 %1050, %v346_v35   ;;  %v255_v37 = vpop.xlane.xlu1 %254  ;;  %v365_v32 = vld [vmem:[%s1410_s1 + $0x38] sm:$0xff] }
  0xdc   :  { %v273_v38 = vmax.f32 %v209_v34, %v255_v37  ;;  %v231_v39 = vpop.xlane.xlu0 %230  ;;  %1023 = vmatpush3.bf16.msra.mxu0 %v1022_v29  ;;  %1035 = vmatpush3.bf16.msra.mxu1 %v1022_v29  ;;  %v1025_v33 = vpack.c.bf16 %v365_v32, %v364_v31 }
  0xdd   :  { %v265_v40 = vmax.f32 %v201_v36, %v231_v39  ;;  %v309_v12 = vld [vmem:[#allocation2 + $0x78] sm:$0xff]  ;;  %1024 = vmatprep.subr.bf16.mxu0 %v1110_v17  ;;  %1036 = vmatprep.subr.bf16.mxu1 %v1110_v17 }
  0xde   :  { %289 = vst.msk [vmem:[#allocation3 + $0x70] sm:$0xff] %vm33_vm0, %v273_v38  ;;  %v341_v18 = vmul.f32 0.00390625, %v309_v12  ;;  %v301_v28 = vld [vmem:[#allocation2 + $0x38] sm:$0xff] }
  0xdf   :  { %281 = vst.msk [vmem:[#allocation3 + $0x30] sm:$0xff] %vm33_vm0, %v265_v40  ;;  %v258_v43 = vpop.xlane.xlu1 %257  ;;  %v333_v30 = vmul.f32 0.00390625, %v301_v28 }
  0xe0   :  { %v274_v44 = vmax.f32 %v210_v41, %v258_v43  ;;  %v234_v45 = vpop.xlane.xlu0 %233  ;;  %1026 = vmatpush3.bf16.msra.mxu0 %v1025_v33  ;;  %1038 = vmatpush3.bf16.msra.mxu1 %v1025_v33 }
  0xe1   :  { %v355_v46 = vld [vmem:[#allocation3 + $0x68] sm:$0xff]  ;;  %v266_v47 = vmax.f32 %v202_v42, %v234_v45  ;;  %1010 = vmatprep.subr.mxu0 %v1107_v0 }
  0xe2   :  { %657 = vperm.xlu0 %1051, %v355_v46   ;;  %v347_v48 = vld [vmem:[#allocation3 + $0x28] sm:$0xff]  ;;  %290 = vst.msk [vmem:[#allocation3 + $0x78] sm:$0xff] %vm33_vm0, %v274_v44 }
  0xe3   :  { %633 = vperm.xlu1 %1050, %v347_v48   ;;  %282 = vst.msk [vmem:[#allocation3 + $0x38] sm:$0xff] %vm33_vm0, %v266_v47 }
  0xe5   :  { %v356_v49 = vld [vmem:[#allocation3 + $0x70] sm:$0xff] }
  0xe6   :  { %660 = vperm.xlu0 %1051, %v356_v49   ;;  %v348_v51 = vld [vmem:[#allocation3 + $0x30] sm:$0xff] }
  0xe7   :  { %636 = vperm.xlu1 %1050, %v348_v51  }
  0xe9   :  { %v357_v24 = vld [vmem:[#allocation3 + $0x78] sm:$0xff] }
  0xea   :  { %384 = vperm.xlu0 %1051, %v326_v53   ;;  %v349_v34 = vld [vmem:[#allocation3 + $0x38] sm:$0xff]  ;;  %v431_v53 = vlaneseq }
  0xeb   :  { %387 = vperm.xlu1 %1050, %v327_v54  }
  0xec   :  { %v432_v56 = vand.u32 127, %v431_v53  ;;  %v1291_v60 = vshrl.u32 %v431_v53, 7 }
  0xee   :  { %414 = vperm.xlu0 %1051, %v336_v57   ;;  %v437_v59 = vadd.s32 4294967288, %v432_v56  ;;  %v465_v4 = vadd.s32 4294967256, %v432_v56  ;;  %v472_v5 = vadd.s32 4294967248, %v432_v56  ;;  %v479_v8 = vadd.s32 4294967240, %v432_v56 }
  0xef   :  { %408 = vperm.xlu1 %1050, %v334_v58  }
  0xf0   :  { %v440_v1 = vsub.s32 %v437_v59, %v1291_v60  ;;  %v1309_v16 = vsub.s32 %v465_v4, %v1291_v60  ;;  %v1312_v17 = vsub.s32 %v472_v5, %v1291_v60  ;;  %v1317_v21 = vsub.s32 %v479_v8, %v1291_v60 }
  0xf2   :  { %417 = vperm.xlu0 %1051, %v337_v61  }
  0xf3   :  { %411 = vperm.xlu1 %1050, %v335_v62   ;;  %v444_v62 = vadd.s32 4294967280, %v432_v56 }
  0xf5   :  { %v447_v9 = vsub.s32 %v444_v62, %v1291_v60 }
  0xf6   :  { %420 = vperm.xlu0 %1051, %v338_v2   ;;  %v451_v2 = vadd.s32 4294967272, %v432_v56 }
  0xf7   :  { %390 = vperm.xlu1 %1050, %v328_v3   ;;  %v458_v3 = vadd.s32 4294967264, %v432_v56 }
  0xf8   :  { %v1303_v13 = vsub.s32 %v451_v2, %v1291_v60 }
  0xf9   :  { %v1306_v15 = vsub.s32 %v458_v3, %v1291_v60 }
  0xfa   :  { %423 = vperm.xlu0 %1051, %v339_v6   ;;  %v435_v6 = vsub.s32 %v432_v56, %v1291_v60 }
  0xfb   :  { %393 = vperm.xlu1 %1050, %v329_v7  }
  0xfe   :  { %426 = vperm.xlu0 %1051, %v340_v10  }
  0xff   :  { %396 = vperm.xlu1 %1050, %v330_v11  }
 0x102   :  { %429 = vperm.xlu0 %1051, %v341_v18  }
 0x103   :  { %399 = vperm.xlu1 %1050, %v331_v19  }
 0x106   :  { %663 = vperm.xlu0 %1051, %v357_v24  }
 0x107   :  { %402 = vperm.xlu1 %1050, %v332_v25  }
 0x10b   :  { %405 = vperm.xlu1 %1050, %v333_v30  }
 0x10f   :  { %639 = vperm.xlu1 %1050, %v349_v34  }
 0x13e   :  { %v1257_v35 = vpop.permute.xlu1 %618 }
 0x13f   :  { %v668_v26 = vrot.slane %v1257_v35, %v435_v6 }
 0x142   :  { %v1259_v36 = vpop.permute.xlu1 %621 }
 0x143   :  { %v672_v18 = vrot.slane %v1259_v36, %v440_v1 }
 0x145   :  { %v673_v33 = vsel %vm442_vm2, %v672_v18, %v668_v26 }
 0x146   :  { %v643_v37 = vpop.permute.xlu1 %642 }
 0x147   :  { %v707_v19 = vrot.slane %v643_v37, %v435_v6 }
 0x149   :  { %v1263_v40 = vpop.permute.xlu0 %648 }
 0x14a   :  { %v646_v38 = vpop.permute.xlu1 %645  ;;  %v716_v22 = vrot.slane %v1263_v40, %v447_v9 }
 0x14b   :  { %v711_v12 = vrot.slane %v646_v38, %v440_v1 }
 0x14d   :  { %v712_v27 = vsel %vm442_vm2, %v711_v12, %v707_v19 }
 0x14e   :  { %v1261_v39 = vpop.permute.xlu1 %624  ;;  %v717_v37 = vsel %vm449_vm3, %v716_v22, %v712_v27 }
 0x14f   :  { %v677_v23 = vrot.slane %v1261_v39, %v447_v9 }
 0x151   :  { %v1265_v41 = vpop.permute.xlu0 %651  ;;  %v678_v38 = vsel %vm449_vm3, %v677_v23, %v673_v33 }
 0x152   :  { %v1267_v42 = vpop.permute.xlu1 %627  ;;  %v721_v34 = vrot.slane %v1265_v41, %v1303_v13 }
 0x153   :  { %v682_v53 = vrot.slane %v1267_v42, %v1303_v13 }
 0x159   :  { %v1269_v43 = vpop.permute.xlu0 %654 }
 0x15a   :  { %v1271_v44 = vpop.permute.xlu1 %630 }
 0x15b   :  { %v687_v62 = vrot.slane %v1271_v44, %v1306_v15 }
 0x161   :  { %v1273_v45 = vpop.permute.xlu0 %657 }
 0x162   :  { %v1275_v46 = vpop.permute.xlu1 %633  ;;  %v731_v42 = vrot.slane %v1273_v45, %v1309_v16 }
 0x163   :  { %v692_v4 = vrot.slane %v1275_v46, %v1309_v16 }
 0x165   :  { %v1277_v47 = vpop.permute.xlu0 %660 }
 0x166   :  { %v1279_v48 = vpop.permute.xlu1 %636  ;;  %v736_v44 = vrot.slane %v1277_v47, %v1312_v17 }
 0x167   :  { %v697_v45 = vrot.slane %v1279_v48, %v1312_v17 }
 0x169   :  { %v1281_v49 = vpop.permute.xlu0 %384 }
 0x16a   :  { %v1283_v50 = vpop.permute.xlu1 %387  ;;  %v436_v29 = vrot.slane %v1281_v49, %v435_v6 }
 0x16b   :  { %v441_v28 = vrot.slane %v1283_v50, %v440_v1 }
 0x16d   :  { %v415_v51 = vpop.permute.xlu0 %414  ;;  %v443_v50 = vsel %vm442_vm2, %v441_v28, %v436_v29 }
 0x16e   :  { %v409_v52 = vpop.permute.xlu1 %408  ;;  %v498_v24 = vrot.slane %v415_v51, %v447_v9 }
 0x16f   :  { %v489_v14 = vrot.slane %v409_v52, %v435_v6 }
 0x171   :  { %v1285_v54 = vpop.permute.xlu0 %417 }
 0x172   :  { %v412_v55 = vpop.permute.xlu1 %411  ;;  %v503_v35 = vrot.slane %v1285_v54, %v1303_v13 }
 0x173   :  { %v493_v7 = vrot.slane %v412_v55, %v440_v1 }
 0x175   :  { %v1287_v57 = vpop.permute.xlu0 %420  ;;  %v494_v20 = vsel %vm442_vm2, %v493_v7, %v489_v14 }
 0x176   :  { %v1289_v58 = vpop.permute.xlu1 %390  ;;  %v499_v30 = vsel %vm449_vm3, %v498_v24, %v494_v20  ;;  %v508_v39 = vrot.slane %v1287_v57, %v1306_v15  ;;  %v722_v57 = vsel %vm456_vm4, %v721_v34, %v717_v37  ;;  %v1112_v34 = vmov 1966171168  }
 0x177   :  { %v448_v31 = vrot.slane %v1289_v58, %v447_v9  ;;  %v504_v41 = vsel %vm456_vm4, %v503_v35, %v499_v30  ;;  %v726_v58 = vrot.slane %v1269_v43, %v1306_v15  ;;  %v683_v9 = vsel %vm456_vm4, %v682_v53, %v678_v38 }
 0x178   :  { %v904_v35 = vunpack.c.l.s4 %v1112_v34 }
 0x179   :  { %v1293_v61 = vpop.permute.xlu0 %423  ;;  %v450_v54 = vsel %vm449_vm3, %v448_v31, %v443_v50  ;;  %v727_v12 = vsel %vm463_vm5, %v726_v58, %v722_v57 }
 0x17a   :  { %v1295_v63 = vpop.permute.xlu1 %393  ;;  %v513_v51 = vrot.slane %v1293_v61, %v1309_v16  ;;  %v732_v48 = vsel %vm470_vm6, %v731_v42, %v727_v12 }
 0x17b   :  { %v455_v36 = vrot.slane %v1295_v63, %v1303_v13  ;;  %v509_v63 = vsel %vm463_vm5, %v508_v39, %v504_v41  ;;  %v688_v13 = vsel %vm463_vm5, %v687_v62, %v683_v9 }
 0x17c   :  { %v514_v43 = vsel %vm470_vm6, %v513_v51, %v509_v63 }
 0x17d   :  { %v1300_v11 = vpop.permute.xlu0 %426  ;;  %v457_v59 = vsel %vm456_vm4, %v455_v36, %v450_v54  ;;  %v905_v36 = vunpack.c.0.s8 %v904_v35 }
 0x17e   :  { %v397_v10 = vpop.permute.xlu1 %396  ;;  %v518_v55 = vrot.slane %v1300_v11, %v1312_v17 }
 0x17f   :  { %v462_v40 = vrot.slane %v397_v10, %v1306_v15  ;;  %v693_v15 = vsel %vm470_vm6, %v692_v4, %v688_v13  ;;  %v908_v37 = vsub.s32 %v905_v36, %v1291_v60 }
 0x180   :  { %v519_v7 = vsel %vm477_vm8, %v518_v55, %v514_v43  ;;  %v698_v18 = vsel %vm477_vm8, %v697_v45, %v693_v15 }
 0x181   :  { %v430_v32 = vpop.permute.xlu0 %429  ;;  %v464_v1 = vsel %vm463_vm5, %v462_v40, %v457_v59 }
 0x182   :  { %v400_v25 = vpop.permute.xlu1 %399  ;;  %v523_v61 = vrot.slane %v430_v32, %v1317_v21 }
 0x183   :  { %v469_v52 = vrot.slane %v400_v25, %v1309_v16 }
 0x184   :  { %v524_v46 = vsel %vm484_vm7, %v523_v61, %v519_v7 }
 0x185   :  { %v664_v2 = vpop.permute.xlu0 %663  ;;  %v471_v5 = vsel %vm470_vm6, %v469_v52, %v464_v1 }
 0x186   :  { %v403_v49 = vpop.permute.xlu1 %402  ;;  %v741_v10 = vrot.slane %v664_v2, %v1317_v21 }
 0x187   :  { %v476_v56 = vrot.slane %v403_v49, %v1312_v17  ;;  %v737_v17 = vsel %vm477_vm8, %v736_v44, %v732_v48 }
 0x188   :  { %v742_v19 = vsel %vm484_vm7, %v741_v10, %v737_v17 }
 0x189   :  { %v478_v8 = vsel %vm477_vm8, %v476_v56, %v471_v5 }
 0x18a   :  { %v406_v3 = vpop.permute.xlu1 %405 }
 0x18b   :  { %v483_v6 = vrot.slane %v406_v3, %v1317_v21 }
 0x18d   :  { %v485_v11 = vsel %vm484_vm7, %v483_v6, %v478_v8 }
 0x18e   :  { %v640_v47 = vpop.permute.xlu1 %639  ;;  %v526_v14 = vsel %vm525_vm9, %v524_v46, %v485_v11 }
 0x18f   :  { %v702_v16 = vrot.slane %v640_v47, %v1317_v21  ;;  %989 = vmatmul.mubr.msk.f32.vlgmr.msra.gmra.mrb[0].mxu0 %vm527_vm10, %v526_v14  ;;  %v366_v21 = vld [vmem:[%s1411_s2] sm:$0xf]  ;;  %s1113_s2 = smov [#allocation7]  }
 0x190   :  { %1012 = vmatprep.mubr.msk.f32.mxu0 %vm1111_vm1, %v1107_v0  ;;  %1011 = vmatpush3.msk.msra.mxu0 %vm822_vm11, %v366_v21  ;;  %s935_s15 = sshll.u32 %s1113_s2, 4  ;;  %s936_s15 = int_to_ptr.vmem [resolvable:$true] %s935_s15 }
 0x191   :  { %v703_v20 = vsel %vm484_vm7, %v702_v16, %v698_v18  ;;  %s1078_s16 = scalar_lea.vmem %s936_s15, 32  ;;  %p1083_p9 = scmp.lt.s32.totalorder %s936_s15, %s936_s15 }
 0x192   :  { %v743_v22 = vsel %vm525_vm9, %v742_v19, %v703_v20  ;;  %p1079_p8 = scmp.ne.s32.totalorder %s936_s15, %s1078_s16  ;;  %p1084_p10 = scmp.lt.s32.totalorder %s1078_s16, %s1078_s16 }
 0x193   :  { %1008 = vmatmul.mubr.msk.f32.vlgmr.msra.gmra.mrb[0].mxu1 %vm527_vm10, %v743_v22 }
 0x194   :  { %p1085_p11 = por %p1084_p10, %p1083_p9 }
 0x196   :  { %p1086_p12 = pnand %p1085_p11, %p1079_p8 }
 0x262   :  { %v596_v23 = vpop.f32.mrb[0].mxu0 }
 0x263   :  { %v990_v24 = vpop.f32.mrb[1].mxu0  ;;  %v600_v26 = vmax.f32 %v596_v23, 0.0 }
 0x266   :  { %v812_v25 = vpop.f32.mrb[0].mxu1 }
 0x267   :  { %v816_v27 = vmax.f32 %v812_v25, 0.0  ;;  %v1009_v0 = vpop.f32.mrb[1].mxu1 }
 0x269   :  { %v817_v28 = vadd.f32 %v816_v27, %v600_v26 }
 0x26b   :  { %1013 = vmatmul.mubr.msk.f32.vlgmr.msra.gmra.mrb[2].mxu0 %vm818_vm12, %v817_v28 }
 0x33e   :  { %v892_v29 = vpop.f32.mrb[2].mxu0 }
 0x33f   :  { %v951_v30 = vmul.f32 -1.442695, %v892_v29  ;;  %v1014_v31 = vpop.f32.mrb[3].mxu0 }
 0x341   :  { %1052 = vpow2.f32 %v951_v30 }
 0x34b   :  { %v1053_v32 = vpop.eup %1052 }
 0x34c   :  { %v899_v33 = vadd.f32 1.0, %v1053_v32 }
 0x34e   :  { %1054 = vrcp.f32 %v899_v33 }
 0x358   :  { %v1055_v38 = vpop.eup %1054 }
 0x359   :  { %v909_v39 = vrot.slane %v1055_v38, %v908_v37 }
 0x35b   :  { %v910_v40 = vcombine.high %v909_v39, %v909_v39  ;;  %v917_v49 = vrot.slane %v909_v39, %v908_v37 }
 0x35d   :  { %v924_v50 = vrot.slane %v910_v40, %v908_v37  ;;  %928 = vst.msk [vmem:[#allocation7] sm:$0x1] %vm927_vm13, %v917_v49 }
 0x35f   :  { %929 = vst.msk [vmem:[#allocation7 + $0x1] sm:$0x1] %vm927_vm13, %v924_v50 }
 0x360   :  { %1089 = shalt.err (!%p1086_p12)
}
 0x361   :  { %s1090_s19 = scalar_lea.hbm %s1412_s3, 32 }
 0x362   :  { %p1091_p13 = scmp.ne.s32.totalorder %s1412_s3, %s1090_s19  ;;  %p1094_p0 = scmp.lt.u32.totalorder %s1090_s19, %s1412_s3 }
 0x364   :  { %p1096_p1 = pnand %p1094_p0, %p1091_p13 }
 0x366   :  { %1099 = shalt.err (!%p1096_p1)
}
 0x367   :  { %s1114_s25 = smov 1  }
 0x368   :  { %941 = dma.vmem_to_hbm [thread:$0]  %s936_s15, 32, %s1412_s3, [#allocation6], %s1106_s23, %s1106_s23, %s1114_s25  }
 0x369   :  { %1102 = dma.done.wait [#allocation6], 32  }
 0x36a   :  { %1103 = vsyncadd [#allocation6], 4294967264 }
 0x36b   :  { %945 = vsyncpa [#allocation5], 1 }
 0x36c   :  { %946 = vsyncpa [#allocation6], 1 }

</bundles_post_ra>
